<compile_context>
chip_gen: v5e
topology: v5e:2x2
jax: 0.10.0
libtpu: 0.0.40
codegen_flags: <defaults>
</compile_context>

<pallas_src>
import functools

import jax
import jax.numpy as jnp
from jax.experimental import pallas as pl
from jax.experimental.pallas import tpu as pltpu

_MIB = 1 << 20


def _ntxent_kernel(zjs_row_ref, zis_row_ref, zjs_col_ref, zis_col_ref,
                   out_ref, *scratch,
                   tm, tn, acc_w, temperature, use_cosine, mxu_dtype, exp_bf16):
    if use_cosine:
        aj_scr, ai_scr, pos_scr, l_j_scr, l_i_scr = scratch
        m_j_scr = m_i_scr = None
    else:
        aj_scr, ai_scr, pos_scr, l_j_scr, l_i_scr, m_j_scr, m_i_scr = scratch

    ri = pl.program_id(0)
    cj = pl.program_id(1)
    n_col = pl.num_programs(1)
    inv_t = jnp.float32(1.0 / temperature)
    two_tn = 2 * tn
    n_grp = two_tn // acc_w
    neg_big = jnp.float32(-1e30)

    def _norm(x):
        if use_cosine:
            sq = jnp.sum(x * x, axis=-1, keepdims=True)
            # rsqrt -> EUP slot; clamp sq-norm at 1e-16 (~ row-norm clamp 1e-8).
            x = x * jax.lax.rsqrt(jnp.maximum(sq, jnp.float32(1e-16)))
        return x

    def _exp(x):
        # bf16 exp only where the EUP has a native bf16 path (v6e / v7x).
        if exp_bf16:
            return jnp.exp(x.astype(jnp.bfloat16)).astype(jnp.float32)
        return jnp.exp(x)

    @pl.when(cj == 0)
    def _init():
        # Row tiles stay resident across the whole column sweep: normalize
        # (cosine), fold 1/T into the row operand, cast to the MXU dtype, and
        # cache in scratch so none of this O(TM*D) prep is redone per cj step.
        zjs_r = _norm(zjs_row_ref[...].astype(jnp.float32))
        zis_r = _norm(zis_row_ref[...].astype(jnp.float32))
        # Positive logit sim(i, partner(i))/T, shared by both halves.
        pos_scr[...] = jnp.sum(zjs_r * zis_r, axis=-1, keepdims=True) * inv_t
        aj_scr[...] = (zjs_r * inv_t).astype(mxu_dtype)
        ai_scr[...] = (zis_r * inv_t).astype(mxu_dtype)
        l_j_scr[...] = jnp.zeros_like(l_j_scr)
        l_i_scr[...] = jnp.zeros_like(l_i_scr)
        if not use_cosine:
            m_j_scr[...] = jnp.full_like(m_j_scr, neg_big)
            m_i_scr[...] = jnp.full_like(m_i_scr, neg_big)

    # Column tiles stream along cj: normalize, then merge both halves into a
    # single (2*TN, D) RHS so each row operand needs one MXU call per step.
    zjs_c = _norm(zjs_col_ref[...].astype(jnp.float32))
    zis_c = _norm(zis_col_ref[...].astype(jnp.float32))
    c_all = jnp.concatenate([zjs_c, zis_c], axis=0).astype(mxu_dtype)  # (2TN, D)

    dims = (((1,), (1,)), ((), ()))          # contract on D, no explicit .T
    s_j = jax.lax.dot_general(aj_scr[...], c_all, dims,
                              preferred_element_type=jnp.float32)   # (TM, 2TN)
    s_i = jax.lax.dot_general(ai_scr[...], c_all, dims,
                              preferred_element_type=jnp.float32)   # (TM, 2TN)

    # Per-tile self-similarity mask.  zjs rows can only hit their own column in
    # the zjs (first) lane half; zis rows only in the zis (second) half.
    r_g = ri * tm + jax.lax.broadcasted_iota(jnp.int32, (tm, two_tn), 0)
    lane = jax.lax.broadcasted_iota(jnp.int32, (tm, two_tn), 1)
    in_first = lane < tn
    c_g = cj * tn + jnp.where(in_first, lane, lane - tn)
    same = r_g == c_g
    s_j = jnp.where(in_first & same, neg_big, s_j)
    s_i = jnp.where(jnp.logical_and(~in_first, same), neg_big, s_i)

    def _grp(s, k):
        return s[:, k * acc_w:(k + 1) * acc_w]

    if use_cosine:
        # Analytic bound: cosine logits live in [-1/T, 1/T]; the fixed max 1/T
        # removes per-step row maxes and accumulator rescales.  Per-step work
        # is lane-group VPU adds into a lane-dense (TM, acc_w) accumulator; the
        # cross-lane reduce happens only once at finalize.
        def _acc(s, l_scr):
            add = _exp(_grp(s, 0) - inv_t)
            for k in range(1, n_grp):
                add = add + _exp(_grp(s, k) - inv_t)
            l_scr[...] = l_scr[...] + add
        _acc(s_j, l_j_scr)
        _acc(s_i, l_i_scr)
    else:
        # Dot-product path: lane-wise online (flash-style) logsumexp.  Each of
        # the acc_w lanes keeps an independent (m, l) pair over the columns it
        # owns; the pairs are merged once at finalize.
        def _acc(s, m_scr, l_scr):
            t_max = _grp(s, 0)
            for k in range(1, n_grp):
                t_max = jnp.maximum(t_max, _grp(s, k))
            m_old = m_scr[...]
            m_new = jnp.maximum(m_old, t_max)
            add = _exp(_grp(s, 0) - m_new)
            for k in range(1, n_grp):
                add = add + _exp(_grp(s, k) - m_new)
            l_scr[...] = l_scr[...] * jnp.exp(m_old - m_new) + add
            m_scr[...] = m_new
        _acc(s_j, m_j_scr, l_j_scr)
        _acc(s_i, m_i_scr, l_i_scr)

    @pl.when(cj == n_col - 1)
    def _finalize():
        pos = pos_scr[...]                                     # (TM, 1)
        if use_cosine:
            lse_j = inv_t + jnp.log(jnp.sum(l_j_scr[...], axis=-1, keepdims=True))
            lse_i = inv_t + jnp.log(jnp.sum(l_i_scr[...], axis=-1, keepdims=True))
        else:
            def _merge(m_scr, l_scr):
                m = m_scr[...]
                m_fin = jnp.max(m, axis=-1, keepdims=True)
                l_fin = jnp.sum(l_scr[...] * jnp.exp(m - m_fin),
                                axis=-1, keepdims=True)
                return m_fin + jnp.log(l_fin)
            lse_j = _merge(m_j_scr, l_j_scr)
            lse_i = _merge(m_i_scr, l_i_scr)
        out_ref[...] = jnp.concatenate([lse_j - pos, lse_i - pos], axis=1)


def _detect_tpu_generation():
    try:
        kind = jax.devices()[0].device_kind.lower()
    except Exception:
        return None
    if "v7" in kind or "tpu7" in kind:
        return "v7"
    for g in ("v6", "v5", "v4", "v3", "v2"):
        if g in kind:
            return g
    return None


def _gen_params(gen):
    # preferred TN, VMEM budget for tile picking, default/physical vmem limits,
    # whether to force >=2 row blocks (2 TensorCores), native bf16 EUP.
    if gen == "v7":
        return dict(tn_pref=256, budget=40 * _MIB, base_limit=48 * _MIB,
                    phys_cap=56 * _MIB, split_rows=True, bf16_exp=True)
    if gen == "v6":
        return dict(tn_pref=256, budget=72 * _MIB, base_limit=100 * _MIB,
                    phys_cap=120 * _MIB, split_rows=False, bf16_exp=True)
    if gen in ("v2", "v3", "v4", "v5"):
        return dict(tn_pref=128, budget=56 * _MIB, base_limit=96 * _MIB,
                    phys_cap=120 * _MIB, split_rows=False, bf16_exp=False)
    # Unknown generation: be conservative (assume the small-VMEM chip).
    return dict(tn_pref=128, budget=32 * _MIB, base_limit=48 * _MIB,
                phys_cap=56 * _MIB, split_rows=False, bf16_exp=False)


def _vmem_estimate(tm, tn, d, in_isz, mxu_isz):
    acc_w = 128 if (2 * tn) % 128 == 0 else 2 * tn
    bufs_in = 2 * (2 * tm * d * in_isz) + 2 * (2 * tn * d * in_isz)  # dbl-buffered
    bufs_out = 2 * (tm * 2 * 4)
    scratch = 2 * tm * d * mxu_isz + 4 * tm * acc_w * 4 + tm * 4
    temps = (2 * tn * d * 4 + 2 * 2 * tn * d * mxu_isz     # col prep + merged RHS
             + 4 * tm * 2 * tn * 4                          # sims + exp tiles
             + 2 * tm * d * 4)                              # row prep at cj == 0
    return bufs_in + bufs_out + scratch + temps


def _pick_tiles(b, d, in_isz, mxu_isz, gp):
    tn = b
    for cand in (gp["tn_pref"], 256, 128, 64, 32, 16, 8):
        if cand <= b and b % cand == 0:
            tn = cand
            break
    tm_cap = b
    if gp["split_rows"] and b >= 16 and b % 2 == 0:
        tm_cap = b // 2          # keep >= 2 "parallel" row blocks for 2 TCs
    cands = [c for c in (512, 256, 128, 64, 32, 16, 8)
             if c <= tm_cap and b % c == 0]
    if not cands:
        cands = [tm_cap if b % tm_cap == 0 else b]
    tm = cands[-1]
    for c in cands:
        if _vmem_estimate(c, tn, d, in_isz, mxu_isz) <= gp["budget"]:
            tm = c
            break
    return tm, tn


def ntxent_loss(zis, zjs, *, temperature=0.5, use_cosine_similarity=True,
                block_rows=None, block_cols=None, precise_mxu=False,
                exp_dtype=None):
    """zis, zjs: (B, D). Returns the scalar NT-Xent loss (float32)."""
    assert zis.shape == zjs.shape and zis.ndim == 2
    b, d = zis.shape

    gen = _detect_tpu_generation()
    gp = _gen_params(gen)

    # MXU operands always bf16 (f32 accumulation) unless exact mode requested:
    # f32 matmul is a slow multi-pass MXU mode on every generation.
    mxu_dtype = jnp.float32 if precise_mxu else jnp.bfloat16
    in_isz = jnp.dtype(zis.dtype).itemsize
    mxu_isz = jnp.dtype(mxu_dtype).itemsize

    tm_auto, tn_auto = _pick_tiles(b, d, in_isz, mxu_isz, gp)
    tm = block_rows if block_rows is not None else tm_auto
    tn = block_cols if block_cols is not None else tn_auto
    assert b % tm == 0 and b % tn == 0, "batch must be a multiple of the tiles"

    if exp_dtype is None:
        exp_dtype = jnp.bfloat16 if gp["bf16_exp"] else jnp.float32
    exp_bf16 = jnp.dtype(exp_dtype) == jnp.dtype(jnp.bfloat16)

    two_tn = 2 * tn
    acc_w = 128 if two_tn % 128 == 0 else two_tn
    grid = (b // tm, b // tn)

    est = _vmem_estimate(tm, tn, d, in_isz, mxu_isz)
    vmem_limit = int(min(gp["phys_cap"], max(gp["base_limit"], est + 16 * _MIB)))

    kernel = functools.partial(
        _ntxent_kernel, tm=tm, tn=tn, acc_w=acc_w,
        temperature=float(temperature),
        use_cosine=bool(use_cosine_similarity),
        mxu_dtype=mxu_dtype, exp_bf16=exp_bf16)

    scratch = [
        pltpu.VMEM((tm, d), mxu_dtype),        # cached zjs row operand (* 1/T)
        pltpu.VMEM((tm, d), mxu_dtype),        # cached zis row operand (* 1/T)
        pltpu.VMEM((tm, 1), jnp.float32),      # positive logit
        pltpu.VMEM((tm, acc_w), jnp.float32),  # l accumulator, zjs rows
        pltpu.VMEM((tm, acc_w), jnp.float32),  # l accumulator, zis rows
    ]
    if not use_cosine_similarity:
        scratch += [pltpu.VMEM((tm, acc_w), jnp.float32),  # running max, zjs rows
                    pltpu.VMEM((tm, acc_w), jnp.float32)]  # running max, zis rows

    per_row = pl.pallas_call(
        kernel,
        out_shape=jax.ShapeDtypeStruct((b, 2), jnp.float32),
        grid_spec=pltpu.PrefetchScalarGridSpec(
            num_scalar_prefetch=0,
            grid=grid,
            in_specs=[
                pl.BlockSpec((tm, d), lambda ri, cj: (ri, 0)),  # zjs row tile
                pl.BlockSpec((tm, d), lambda ri, cj: (ri, 0)),  # zis row tile
                pl.BlockSpec((tn, d), lambda ri, cj: (cj, 0)),  # zjs col tile
                pl.BlockSpec((tn, d), lambda ri, cj: (cj, 0)),  # zis col tile
            ],
            out_specs=pl.BlockSpec((tm, 2), lambda ri, cj: (ri, 0)),
            scratch_shapes=scratch,
        ),
        compiler_params=pltpu.CompilerParams(
            dimension_semantics=("parallel", "arbitrary"),
            vmem_limit_bytes=vmem_limit),
    )(zjs, zis, zjs, zis)

    # Tiny XLA reduction over the 2B per-row losses (the row axis is
    # "parallel", so the kernel cannot accumulate across it).
    return jnp.sum(per_row) / jnp.float32(2 * b)


def _reference_ntxent(zis, zjs, temperature, use_cosine):
    # Pure-JAX reference mirroring the PyTorch module (for the sanity check).
    b = zis.shape[0]
    n = 2 * b
    reps = jnp.concatenate([zjs, zis], axis=0).astype(jnp.float32)
    if use_cosine:
        norm = jnp.linalg.norm(reps, axis=-1, keepdims=True)
        reps_n = reps / jnp.maximum(norm, 1e-8)
        sim = reps_n @ reps_n.T
    else:
        sim = reps @ reps.T
    l_pos = jnp.diagonal(sim, offset=b)
    r_pos = jnp.diagonal(sim, offset=-b)
    positives = jnp.concatenate([l_pos, r_pos]).reshape(n, 1)
    mask = ~(jnp.eye(n, dtype=bool)
             | jnp.eye(n, k=b, dtype=bool)
             | jnp.eye(n, k=-b, dtype=bool))
    negatives = sim[mask].reshape(n, n - 2)
    logits = jnp.concatenate([positives, negatives], axis=1) / temperature
    lse = jax.scipy.special.logsumexp(logits, axis=1)   # CE label 0, sum-reduced
    loss = jnp.sum(lse - logits[:, 0])
    return loss / n


if __name__ == "__main__":
    key = jax.random.PRNGKey(0)
    k1, k2 = jax.random.split(key)

    batch_size = 16      # -> 2B = 32 rows of the similarity matrix
    hidden = 32
    temperature = 0.5

    zis = jax.random.normal(k1, (batch_size, hidden), dtype=jnp.float32)
    zjs = jax.random.normal(k2, (batch_size, hidden), dtype=jnp.float32)

    ok = True
    for use_cosine in (True, False):
        ref = _reference_ntxent(zis, zjs, temperature, use_cosine)

        # Exact path (f32 MXU + f32 exp); block_rows/cols=8 force a (2, 2) grid
        # so the init / online-accumulate / finalize phases are all exercised.
        loss = ntxent_loss(zis, zjs, temperature=temperature,
                           use_cosine_similarity=use_cosine,
                           block_rows=8, block_cols=8,
                           precise_mxu=True, exp_dtype=jnp.float32)
        loss = jax.block_until_ready(loss)
        if not jnp.allclose(loss, ref, rtol=1e-3, atol=1e-3):
            ok = False
            print("MISMATCH exact", use_cosine, float(loss), float(ref))

        # Fast path (default tiling, bf16 MXU operands, generation-dependent
        # exp dtype) -> bf16-quantized logits, hence the looser tolerance.
        loss_fast = ntxent_loss(zis, zjs, temperature=temperature,
                                use_cosine_similarity=use_cosine)
        loss_fast = jax.block_until_ready(loss_fast)
        if not jnp.allclose(loss_fast, ref, rtol=2e-2, atol=2e-2):
            ok = False
            print("MISMATCH fast", use_cosine, float(loss_fast), float(ref))

    if ok:
        print("KERNEL_OK")
</pallas_src>

<mosaic_0001>
module attributes {stable_mosaic.version = 11 : i64} {
  func.func @_ntxent_kernel(%arg0: i32, %arg1: i32, %arg2: memref<8x32xf32, #tpu.memory_space<vmem>>, %arg3: memref<8x32xf32, #tpu.memory_space<vmem>>, %arg4: memref<8x32xf32, #tpu.memory_space<vmem>>, %arg5: memref<8x32xf32, #tpu.memory_space<vmem>>, %arg6: memref<8x2xf32, #tpu.memory_space<vmem>>, %arg7: memref<8x32xf32, #tpu.memory_space<vmem>>, %arg8: memref<8x32xf32, #tpu.memory_space<vmem>>, %arg9: memref<8x1xf32, #tpu.memory_space<vmem>>, %arg10: memref<8x16xf32, #tpu.memory_space<vmem>>, %arg11: memref<8x16xf32, #tpu.memory_space<vmem>>) attributes {dimension_semantics = [#tpu.dimension_semantics<parallel>, #tpu.dimension_semantics<arbitrary>], iteration_bounds = array<i64: 2, 2>, scalar_prefetch = 0 : i64, scratch_operands = 5 : i64, tpu.core_type = #tpu.core_type<tc>, window_params = [{transform_indices = @transform_0, window_bounds = array<i64: 8, 32>}, {transform_indices = @transform_1, window_bounds = array<i64: 8, 32>}, {transform_indices = @transform_2, window_bounds = array<i64: 8, 32>}, {transform_indices = @transform_3, window_bounds = array<i64: 8, 32>}, {transform_indices = @transform_4, window_bounds = array<i64: 8, 2>}]} {
    %c0_i32 = arith.constant 0 : i32
    %0 = arith.cmpi eq, %arg1, %c0_i32 : i32
    %1 = arith.extui %0 : i1 to i32
    %cst = arith.constant 2.000000e+00 : f32
    %c0_i32_0 = arith.constant 0 : i32
    %2 = arith.cmpi ne, %1, %c0_i32_0 : i32
    scf.if %2 {
      %c0_32 = arith.constant 0 : index
      %c0_33 = arith.constant 0 : index
      %62 = vector.load %arg2[%c0_32, %c0_33] : memref<8x32xf32, #tpu.memory_space<vmem>>, vector<8x32xf32>
      %63 = arith.mulf %62, %62 : vector<8x32xf32>
      %cst_34 = arith.constant dense<0.000000e+00> : vector<8xf32>
      %64 = vector.multi_reduction <add>, %63, %cst_34 [1] : vector<8x32xf32> to vector<8xf32>
      %65 = vector.shape_cast %64 : vector<8xf32> to vector<8x1xf32>
      %cst_35 = arith.constant 1.000000e-16 : f32
      %66 = vector.broadcast %cst_35 : f32 to vector<8x1xf32>
      %67 = arith.maximumf %65, %66 : vector<8x1xf32>
      %68 = math.rsqrt %67 : vector<8x1xf32>
      %69 = vector.broadcast %68 : vector<8x1xf32> to vector<8x32xf32>
      %70 = arith.mulf %62, %69 : vector<8x32xf32>
      %c0_36 = arith.constant 0 : index
      %c0_37 = arith.constant 0 : index
      %71 = vector.load %arg3[%c0_36, %c0_37] : memref<8x32xf32, #tpu.memory_space<vmem>>, vector<8x32xf32>
      %72 = arith.mulf %71, %71 : vector<8x32xf32>
      %cst_38 = arith.constant dense<0.000000e+00> : vector<8xf32>
      %73 = vector.multi_reduction <add>, %72, %cst_38 [1] : vector<8x32xf32> to vector<8xf32>
      %74 = vector.shape_cast %73 : vector<8xf32> to vector<8x1xf32>
      %cst_39 = arith.constant 1.000000e-16 : f32
      %75 = vector.broadcast %cst_39 : f32 to vector<8x1xf32>
      %76 = arith.maximumf %74, %75 : vector<8x1xf32>
      %77 = math.rsqrt %76 : vector<8x1xf32>
      %78 = vector.broadcast %77 : vector<8x1xf32> to vector<8x32xf32>
      %79 = arith.mulf %71, %78 : vector<8x32xf32>
      %80 = arith.mulf %70, %79 : vector<8x32xf32>
      %cst_40 = arith.constant dense<0.000000e+00> : vector<8xf32>
      %81 = vector.multi_reduction <add>, %80, %cst_40 [1] : vector<8x32xf32> to vector<8xf32>
      %82 = vector.shape_cast %81 : vector<8xf32> to vector<8x1xf32>
      %83 = vector.broadcast %cst : f32 to vector<8x1xf32>
      %84 = arith.mulf %82, %83 : vector<8x1xf32>
      %c0_41 = arith.constant 0 : index
      %c0_42 = arith.constant 0 : index
      %85 = vector.load %arg9[%c0_41, %c0_42] : memref<8x1xf32, #tpu.memory_space<vmem>>, vector<8x1xf32>
      tpu.vector_store %arg9[%c0_41, %c0_42], %84 {strides = array<i32>} : memref<8x1xf32, #tpu.memory_space<vmem>>, vector<8x1xf32>,
      %86 = vector.broadcast %cst : f32 to vector<8x32xf32>
      %87 = arith.mulf %70, %86 : vector<8x32xf32>
      %c0_43 = arith.constant 0 : index
      %c0_44 = arith.constant 0 : index
      %88 = vector.load %arg7[%c0_43, %c0_44] : memref<8x32xf32, #tpu.memory_space<vmem>>, vector<8x32xf32>
      tpu.vector_store %arg7[%c0_43, %c0_44], %87 {strides = array<i32>} : memref<8x32xf32, #tpu.memory_space<vmem>>, vector<8x32xf32>,
      %89 = vector.broadcast %cst : f32 to vector<8x32xf32>
      %90 = arith.mulf %79, %89 : vector<8x32xf32>
      %c0_45 = arith.constant 0 : index
      %c0_46 = arith.constant 0 : index
      %91 = vector.load %arg8[%c0_45, %c0_46] : memref<8x32xf32, #tpu.memory_space<vmem>>, vector<8x32xf32>
      tpu.vector_store %arg8[%c0_45, %c0_46], %90 {strides = array<i32>} : memref<8x32xf32, #tpu.memory_space<vmem>>, vector<8x32xf32>,
      %cst_47 = arith.constant 0.000000e+00 : f32
      %92 = vector.broadcast %cst_47 : f32 to vector<8x16xf32>
      %c0_48 = arith.constant 0 : index
      %c0_49 = arith.constant 0 : index
      %93 = vector.load %arg10[%c0_48, %c0_49] : memref<8x16xf32, #tpu.memory_space<vmem>>, vector<8x16xf32>
      tpu.vector_store %arg10[%c0_48, %c0_49], %92 {strides = array<i32>} : memref<8x16xf32, #tpu.memory_space<vmem>>, vector<8x16xf32>,
      %cst_50 = arith.constant 0.000000e+00 : f32
      %94 = vector.broadcast %cst_50 : f32 to vector<8x16xf32>
      %c0_51 = arith.constant 0 : index
      %c0_52 = arith.constant 0 : index
      %95 = vector.load %arg11[%c0_51, %c0_52] : memref<8x16xf32, #tpu.memory_space<vmem>>, vector<8x16xf32>
      tpu.vector_store %arg11[%c0_51, %c0_52], %94 {strides = array<i32>} : memref<8x16xf32, #tpu.memory_space<vmem>>, vector<8x16xf32>,
    } else {
    }
    %c0 = arith.constant 0 : index
    %c0_1 = arith.constant 0 : index
    %3 = vector.load %arg4[%c0, %c0_1] : memref<8x32xf32, #tpu.memory_space<vmem>>, vector<8x32xf32>
    %4 = arith.mulf %3, %3 : vector<8x32xf32>
    %cst_2 = arith.constant dense<0.000000e+00> : vector<8xf32>
    %5 = vector.multi_reduction <add>, %4, %cst_2 [1] : vector<8x32xf32> to vector<8xf32>
    %6 = vector.shape_cast %5 : vector<8xf32> to vector<8x1xf32>
    %cst_3 = arith.constant 1.000000e-16 : f32
    %7 = vector.broadcast %cst_3 : f32 to vector<8x1xf32>
    %8 = arith.maximumf %6, %7 : vector<8x1xf32>
    %9 = math.rsqrt %8 : vector<8x1xf32>
    %10 = vector.broadcast %9 : vector<8x1xf32> to vector<8x32xf32>
    %11 = arith.mulf %3, %10 : vector<8x32xf32>
    %c0_4 = arith.constant 0 : index
    %c0_5 = arith.constant 0 : index
    %12 = vector.load %arg5[%c0_4, %c0_5] : memref<8x32xf32, #tpu.memory_space<vmem>>, vector<8x32xf32>
    %13 = arith.mulf %12, %12 : vector<8x32xf32>
    %cst_6 = arith.constant dense<0.000000e+00> : vector<8xf32>
    %14 = vector.multi_reduction <add>, %13, %cst_6 [1] : vector<8x32xf32> to vector<8xf32>
    %15 = vector.shape_cast %14 : vector<8xf32> to vector<8x1xf32>
    %cst_7 = arith.constant 1.000000e-16 : f32
    %16 = vector.broadcast %cst_7 : f32 to vector<8x1xf32>
    %17 = arith.maximumf %15, %16 : vector<8x1xf32>
    %18 = math.rsqrt %17 : vector<8x1xf32>
    %19 = vector.broadcast %18 : vector<8x1xf32> to vector<8x32xf32>
    %20 = arith.mulf %12, %19 : vector<8x32xf32>
    %21 = tpu.concatenate %11, %20 in 0 : vector<8x32xf32>, vector<8x32xf32> -> vector<16x32xf32>
    %c0_8 = arith.constant 0 : index
    %c0_9 = arith.constant 0 : index
    %22 = vector.load %arg7[%c0_8, %c0_9] : memref<8x32xf32, #tpu.memory_space<vmem>>, vector<8x32xf32>
    %cst_10 = arith.constant dense<0.000000e+00> : vector<8x16xf32>
    %23 = tpu.matmul %22, %21, %cst_10 {dimension_numbers = #tpu.dot_dimension_numbers<[1], [1], [0], [0], [0, 0, 1, 0], [], []>} : vector<8x32xf32>, vector<16x32xf32>, vector<8x16xf32> -> vector<8x16xf32>
    %c0_11 = arith.constant 0 : index
    %c0_12 = arith.constant 0 : index
    %24 = vector.load %arg8[%c0_11, %c0_12] : memref<8x32xf32, #tpu.memory_space<vmem>>, vector<8x32xf32>
    %cst_13 = arith.constant dense<0.000000e+00> : vector<8x16xf32>
    %25 = tpu.matmul %24, %21, %cst_13 {dimension_numbers = #tpu.dot_dimension_numbers<[1], [1], [0], [0], [0, 0, 1, 0], [], []>} : vector<8x32xf32>, vector<16x32xf32>, vector<8x16xf32> -> vector<8x16xf32>
    %c8_i32 = arith.constant 8 : i32
    %26 = arith.muli %arg0, %c8_i32 : i32
    %27 = tpu.iota {dimensions = array<i32: 0>} : vector<8x16xi32>
    %28 = vector.broadcast %26 : i32 to vector<8x16xi32>
    %29 = arith.addi %28, %27 : vector<8x16xi32>
    %30 = tpu.iota {dimensions = array<i32: 1>} : vector<8x16xi32>
    %c8_i32_14 = arith.constant 8 : i32
    %31 = vector.broadcast %c8_i32_14 : i32 to vector<8x16xi32>
    %32 = arith.cmpi slt, %30, %31 : vector<8x16xi32>
    %c8_i32_15 = arith.constant 8 : i32
    %33 = arith.muli %arg1, %c8_i32_15 : i32
    %c8_i32_16 = arith.constant 8 : i32
    %34 = vector.broadcast %c8_i32_16 : i32 to vector<8x16xi32>
    %35 = arith.subi %30, %34 : vector<8x16xi32>
    %36 = arith.select %32, %30, %35 : vector<8x16xi1>, vector<8x16xi32>
    %37 = vector.broadcast %33 : i32 to vector<8x16xi32>
    %38 = arith.addi %37, %36 : vector<8x16xi32>
    %39 = arith.cmpi eq, %29, %38 : vector<8x16xi32>
    %40 = arith.andi %32, %39 : vector<8x16xi1>
    %cst_17 = arith.constant -1.000000e+30 : f32
    %41 = vector.broadcast %cst_17 : f32 to vector<8x16xf32>
    %42 = arith.select %40, %41, %23 : vector<8x16xi1>, vector<8x16xf32>
    %cst_18 = arith.constant dense<true> : vector<8x16xi1>
    %43 = arith.xori %32, %cst_18 : vector<8x16xi1>
    %44 = arith.andi %43, %39 : vector<8x16xi1>
    %cst_19 = arith.constant -1.000000e+30 : f32
    %45 = vector.broadcast %cst_19 : f32 to vector<8x16xf32>
    %46 = arith.select %44, %45, %25 : vector<8x16xi1>, vector<8x16xf32>
    %cst_20 = arith.constant 2.000000e+00 : f32
    %47 = vector.broadcast %cst_20 : f32 to vector<8x16xf32>
    %48 = arith.subf %42, %47 : vector<8x16xf32>
    %49 = math.exp %48 : vector<8x16xf32>
    %c0_21 = arith.constant 0 : index
    %c0_22 = arith.constant 0 : index
    %50 = vector.load %arg10[%c0_21, %c0_22] : memref<8x16xf32, #tpu.memory_space<vmem>>, vector<8x16xf32>
    %51 = arith.addf %50, %49 : vector<8x16xf32>
    %c0_23 = arith.constant 0 : index
    %c0_24 = arith.constant 0 : index
    %52 = vector.load %arg10[%c0_23, %c0_24] : memref<8x16xf32, #tpu.memory_space<vmem>>, vector<8x16xf32>
    tpu.vector_store %arg10[%c0_23, %c0_24], %51 {strides = array<i32>} : memref<8x16xf32, #tpu.memory_space<vmem>>, vector<8x16xf32>,
    %cst_25 = arith.constant 2.000000e+00 : f32
    %53 = vector.broadcast %cst_25 : f32 to vector<8x16xf32>
    %54 = arith.subf %46, %53 : vector<8x16xf32>
    %55 = math.exp %54 : vector<8x16xf32>
    %c0_26 = arith.constant 0 : index
    %c0_27 = arith.constant 0 : index
    %56 = vector.load %arg11[%c0_26, %c0_27] : memref<8x16xf32, #tpu.memory_space<vmem>>, vector<8x16xf32>
    %57 = arith.addf %56, %55 : vector<8x16xf32>
    %c0_28 = arith.constant 0 : index
    %c0_29 = arith.constant 0 : index
    %58 = vector.load %arg11[%c0_28, %c0_29] : memref<8x16xf32, #tpu.memory_space<vmem>>, vector<8x16xf32>
    tpu.vector_store %arg11[%c0_28, %c0_29], %57 {strides = array<i32>} : memref<8x16xf32, #tpu.memory_space<vmem>>, vector<8x16xf32>,
    %c1_i32 = arith.constant 1 : i32
    %59 = arith.cmpi eq, %arg1, %c1_i32 : i32
    %60 = arith.extui %59 : i1 to i32
    %cst_30 = arith.constant 2.000000e+00 : f32
    %c0_i32_31 = arith.constant 0 : i32
    %61 = arith.cmpi ne, %60, %c0_i32_31 : i32
    scf.if %61 {
      %c0_32 = arith.constant 0 : index
      %c0_33 = arith.constant 0 : index
      %62 = vector.load %arg9[%c0_32, %c0_33] : memref<8x1xf32, #tpu.memory_space<vmem>>, vector<8x1xf32>
      %c0_34 = arith.constant 0 : index
      %c0_35 = arith.constant 0 : index
      %63 = vector.load %arg10[%c0_34, %c0_35] : memref<8x16xf32, #tpu.memory_space<vmem>>, vector<8x16xf32>
      %cst_36 = arith.constant dense<0.000000e+00> : vector<8xf32>
      %64 = vector.multi_reduction <add>, %63, %cst_36 [1] : vector<8x16xf32> to vector<8xf32>
      %65 = vector.shape_cast %64 : vector<8xf32> to vector<8x1xf32>
      %66 = math.log %65 : vector<8x1xf32>
      %67 = vector.broadcast %cst_30 : f32 to vector<8x1xf32>
      %68 = arith.addf %67, %66 : vector<8x1xf32>
      %c0_37 = arith.constant 0 : index
      %c0_38 = arith.constant 0 : index
      %69 = vector.load %arg11[%c0_37, %c0_38] : memref<8x16xf32, #tpu.memory_space<vmem>>, vector<8x16xf32>
      %cst_39 = arith.constant dense<0.000000e+00> : vector<8xf32>
      %70 = vector.multi_reduction <add>, %69, %cst_39 [1] : vector<8x16xf32> to vector<8xf32>
      %71 = vector.shape_cast %70 : vector<8xf32> to vector<8x1xf32>
      %72 = math.log %71 : vector<8x1xf32>
      %73 = vector.broadcast %cst_30 : f32 to vector<8x1xf32>
      %74 = arith.addf %73, %72 : vector<8x1xf32>
      %75 = arith.subf %68, %62 : vector<8x1xf32>
      %76 = arith.subf %74, %62 : vector<8x1xf32>
      %77 = tpu.concatenate %75, %76 in 1 : vector<8x1xf32>, vector<8x1xf32> -> vector<8x2xf32>
      %c0_40 = arith.constant 0 : index
      %c0_41 = arith.constant 0 : index
      %78 = vector.load %arg6[%c0_40, %c0_41] : memref<8x2xf32, #tpu.memory_space<vmem>>, vector<8x2xf32>
      tpu.vector_store %arg6[%c0_40, %c0_41], %77 {strides = array<i32>} : memref<8x2xf32, #tpu.memory_space<vmem>>, vector<8x2xf32>,
    } else {
    }
    return
  }
  func.func @transform_0(%arg0: i32, %arg1: i32) -> (i32, i32) {
    %c0_i32 = arith.constant 0 : i32
    %c0_i32_0 = arith.constant 0 : i32
    return %arg0, %c0_i32 : i32, i32
  }
  func.func @transform_1(%arg0: i32, %arg1: i32) -> (i32, i32) {
    %c0_i32 = arith.constant 0 : i32
    %c0_i32_0 = arith.constant 0 : i32
    return %arg0, %c0_i32 : i32, i32
  }
  func.func @transform_2(%arg0: i32, %arg1: i32) -> (i32, i32) {
    %c0_i32 = arith.constant 0 : i32
    %c0_i32_0 = arith.constant 0 : i32
    return %arg1, %c0_i32 : i32, i32
  }
  func.func @transform_3(%arg0: i32, %arg1: i32) -> (i32, i32) {
    %c0_i32 = arith.constant 0 : i32
    %c0_i32_0 = arith.constant 0 : i32
    return %arg1, %c0_i32 : i32, i32
  }
  func.func @transform_4(%arg0: i32, %arg1: i32) -> (i32, i32) {
    %c0_i32 = arith.constant 0 : i32
    %c0_i32_0 = arith.constant 0 : i32
    return %arg0, %c0_i32 : i32, i32
  }
}

</mosaic_0001>

<bundles_post_ra>
// kernel: tpu_custom_call.1
= control target key start
LH: loop header
LB: loop body
LE: loop exit
PB: predicated region body
PF: predicated region fallthrough
CT: control target
= control target key end

     0   :  { %s1334_s0 = inlined_call_operand.hbm [shape: f32[16,32], index: 0, kind: input, shape index: {}]   ;;  %s1335_s1 = inlined_call_operand.hbm [shape: f32[16,32], index: 1, kind: input, shape index: {}]   ;;  %s1336_s2 = inlined_call_operand.hbm [shape: f32[16,32], index: 2, kind: input, shape index: {}]   ;;  %s1337_s3 = inlined_call_operand.hbm [shape: f32[16,32], index: 3, kind: input, shape index: {}]   ;;  %s1338_s4 = inlined_call_operand.vmem [shape: f32[16,2], index: 4, kind: output, shape index: {}]  }
   0x1   :  { %1343 = sst [smem:[#allocation21_spill]] %s1334_s0 }
   0x2   :  { %1344 = sst [smem:[#allocation22_spill]] %s1335_s1 }
   0x3   :  { %1345 = sst [smem:[#allocation23_spill]] %s1336_s2 }
   0x4   :  { %1346 = sst [smem:[#allocation24_spill]] %s1338_s4 }
   0x5   :  { %9 = vsyncpa [#allocation8], 0 }
   0x6   :  { %11 = vsyncpa [#allocation8 + $0x1], 0 }
   0x7   :  { %12 = vsyncpa [#allocation10], 0 }
   0x8   :  { %14 = vsyncpa [#allocation10 + $0x1], 0 }
   0x9   :  { %15 = vsyncpa [#allocation13], 0 }
   0xa   :  { %17 = vsyncpa [#allocation13 + $0x1], 0  ;;  %s1100_s15 = smov 0   ;;  %s1102_s16 = smov 0  }
   0xb   :  { %s1104_s17 = smov 0   ;;  %s1106_s18 = smov 0  }
   0xc   :  { %s1108_s19 = smov 0   ;;  %s1110_s20 = smov 0  }
   0xd   :  { %s1112_s21 = smov 0   ;;  %s1114_s22 = smov 0  }
   0xe   :  { %s1116_s23 = smov 0   ;;  %s1118_s24 = smov 0  }
   0xf   :  { %s1120_s25 = smov 0  }
  0x10 LB: > { %1347 = sst [smem:[#allocation18_spill]] %s1054_s21  ;;  %s1339_s26 = sadd.s32 4294967295, %s1070_s25   ;;  %s1070_s25 = sphi %s1120_s25, %s23_s25   ;;  %s1066_s24 = sphi %s1118_s24, %s1374_s24   ;;  %s1062_s23 = sphi %s1116_s23, %s1366_s23   ;;  %s1058_s22 = sphi %s1114_s22, %s1373_s22   ;;  %s1054_s21 = sphi %s1112_s21, %s1365_s21   ;;  %s1050_s20 = sphi %s1110_s20, %s1372_s20   ;;  %s1046_s19 = sphi %s1108_s19, %s1371_s19   ;;  %s1042_s18 = sphi %s1106_s18, %s1370_s18   ;;  %s1038_s17 = sphi %s1104_s17, %s1369_s17   ;;  %s1034_s16 = sphi %s1102_s16, %s1368_s16   ;;  %s1030_s15 = sphi %s1100_s15, %s1367_s15  }
  0x11   : > { %1348 = sst [smem:[#allocation19_spill]] %s1062_s23  ;;  %p49_p0 = scmp.ne.s32.totalorder %s1050_s20, %s1046_s19 }
  0x12   : > { %p50_p1 = scmp.eq.s32.totalorder %s1070_s25, 0  ;;  %p55_p2 = scmp.ne.s32.totalorder %s1046_s19, %s1042_s18 }
  0x13   : > { %p56_p3 = scmp.eq.s32.totalorder %s1339_s26, 0  ;;  %p101_p4 = scmp.ne.s32.totalorder %s1038_s17, %s1034_s16 }
  0x14   : > { %p51_p5 = por %p50_p1, %p49_p0  ;;  %p107_p6 = scmp.ne.s32.totalorder %s1034_s16, %s1030_s15 }
  0x15   : > { %p1163_p7 = por %p56_p3, %p55_p2  ;;  %p1167_p8 = por %p101_p4, %p50_p1 }
  0x16   : > { %p1171_p9 = por %p107_p6, %p56_p3  ;;  %p740_p10 = scmp.lt.s32.totalorder %s1070_s25, 4 }
  0x17   : > { %s183_s6 = sand.u32 1, %s1050_s20   ;;  %s691_s8 = sshll.u32 %s1066_s24, 3 }
  0x18   : > { %s690_s7 = sshll.u32 %s183_s6, 3  ;;  %p1180_p11 = pnand %p740_p10, %p51_p5 }
  0x19   : > { %s202_s10 = sand.u32 1, %s1070_s25   ;;  %s1353_s1 = sld [smem:[#allocation22_spill]] }
  0x1a   : > { %s206_s15 = scalar_lea.vmem [#allocation9], %s690_s7  ;;  %s1188_s26 = scalar_lea.sflag [#allocation10], %s202_s10 }
  0x1b   : > { %s214_s18 = sshll.u32 %s206_s15, 4  ;;  %p1197_p12 = pnand %p740_p10, %p1167_p8  ;;  %s215_s18 = int_to_ptr.vmem [resolvable:$true] %s214_s18 }
  0x1c   : > { %p698_p13 = scmp.ge.s32.totalorder %s1070_s25, 1  ;;  %p257_p0 = scmp.lt.s32.totalorder %s1070_s25, 5 }
  0x1d   : > { %s1356_s0 = sld [smem:[#allocation21_spill]]  ;;  %s187_s30 = scalar_lea.vmem [#allocation7], %s690_s7 }
  0x1e   : > { %p1203_p1 = pnand %p698_p13, %p257_p0  ;;  %s94_s27 = sadd.s32 1, %s1038_s17 }
  0x1f   : > { %s210_s13 = scalar_lea.hbm %s1353_s1, %s691_s8  ;;  %s223_s1 = sand.u32 1, %s1038_s17  }
  0x20   : > { %s212_s14 = sshll.u32 %s210_s13, 4  ;;  %s32_s21 = sadd.s32 1, %s1062_s23  ;;  %s213_s14 = int_to_ptr.hbm [resolvable:$true] %s212_s14 }
  0x21   : > { %733 = dma.hbm_to_vmem [thread:$0]  (!%p1180_p11), %s213_s14, 128, %s215_s18, %s1188_s26  }
  0x22   : > { %s195_s14 = sshll.u32 %s187_s30, 4  ;;  %s184_s18 = scalar_lea.sflag [#allocation8], %s183_s6  ;;  %s196_s14 = int_to_ptr.vmem [resolvable:$true] %s195_s14 }
  0x23   : > { %s191_s13 = scalar_lea.hbm %s1356_s0, %s691_s8  ;;  %s694_s4 = sshll.u32 %s223_s1, 3 }
  0x24   : > { %s193_s15 = sshll.u32 %s191_s13, 4  ;;  %p33_p2 = scmp.ge.s32.totalorder %s32_s21, 2  ;;  %s194_s15 = int_to_ptr.hbm [resolvable:$true] %s193_s15 }
  0x25   : > { %730 = dma.hbm_to_vmem [thread:$0]  (!%p1180_p11), %s194_s15, 128, %s196_s14, %s184_s18  }
  0x26   : > { %s695_s12 = sshll.u32 %s1062_s23, 3  ;;  %s225_s8 = scalar_lea.vmem [#allocation11], %s694_s4 }
  0x27   : > { %s233_s7 = sshll.u32 %s225_s8, 4  ;;  %s1376_s21 = smov (%p33_p2, %s32_s21), 0  ;;  %s234_s7 = int_to_ptr.vmem [resolvable:$true] %s233_s7 }
  0x28   : > { %1357 = sst [smem:[#allocation20_spill]] %s1376_s21  ;;  %s1358_s10 = sadd.s32 1, %s1066_s24 }
  0x29   : > { %s1378_s10 = smov (!%p33_p2, %s1358_s10), %s1066_s24  ;;  %s91_s6 = ssub.s32 %s1062_s23, %s1376_s21 }
  0x2a   : > { %s1359_s2 = sld [smem:[#allocation23_spill]]  ;;  %p37_p3 = scmp.ge.s32.totalorder %s1378_s10, 2 }
  0x2b   : > { %p92_p4 = scmp.eq.s32.totalorder %s91_s6, 0  ;;  %s1360_s8 = sadd.s32 1, %s1050_s20 }
  0x2c   : > { %s1380_s10 = smov (%p37_p3, %s1378_s10), 0  ;;  %s248_s6 = scalar_lea.hbm %s1337_s3, %s695_s12 }
  0x2d   : > { %s1229_s14 = scalar_select %p92_p4, %s1038_s17, %s94_s27  }
  0x2e   : > { %s39_s18 = ssub.s32 %s1066_s24, %s1380_s10  ;;  %s241_s23 = scalar_lea.sflag [#allocation13], %s223_s1 }
  0x2f   : > { %p40_p5 = scmp.eq.s32.totalorder %s39_s18, 0 }
  0x30   : > { %s229_s15 = scalar_lea.hbm %s1359_s2, %s695_s12  ;;  %s244_s2 = scalar_lea.vmem [#allocation12], %s694_s4 }
  0x31   : > { %s231_s30 = sshll.u32 %s229_s15, 4  ;;  %s250_s15 = sshll.u32 %s248_s6, 4  ;;  %s232_s30 = int_to_ptr.hbm [resolvable:$true] %s231_s30  ;;  %s251_s15 = int_to_ptr.hbm [resolvable:$true] %s250_s15 }
  0x32   : > { %736 = dma.hbm_to_vmem [thread:$0]  (!%p1197_p12), %s232_s30, 128, %s234_s7, %s1188_s26  }
  0x33   : > { %s1239_s0 = scalar_select %p40_p5, %s1050_s20, %s1360_s8  }
  0x34   : > { %s252_s21 = sshll.u32 %s244_s2, 4  ;;  %261 = sbr.rel (%p1203_p1) target bundleno = 903 (0x387), region = 36  ;;  %s253_s21 = int_to_ptr.vmem [resolvable:$true] %s252_s21 }
  0x35   : > { %739 = dma.hbm_to_vmem [thread:$0]  (!%p1197_p12), %s251_s15, 128, %s253_s21, %s241_s23  }
  0x36   : > { %s263_s26 = sand.u32 (!%p1203_p1), 1, %s1046_s19  }
  0x37   : > { %s699_s27 = sshll.u32 (!%p1203_p1), %s263_s26, 3  ;;  %s264_s7 = scalar_lea.sflag (!%p1203_p1), [#allocation8], %s263_s26 }
  0x38   : > { %s267_s30 = scalar_lea.vmem (!%p1203_p1), [#allocation7], %s699_s27 }
  0x39   : > { %1013 = dma.done.wait (%p1163_p7), %s264_s7, 128  }
  0x3a   : > { %1015 = vsyncadd (%p1163_p7), %s264_s7, 4294967168  ;;  %s1361_s2 = sadd.s32 4294967295, %s1070_s25   ;;  %s277_s21 = scalar_lea.vmem [#allocation9], %s699_s27 }
  0x3b   : > { %s273_s1 = sand.u32 1, %s1361_s2  }
  0x3c   : > { %s274_s4 = scalar_lea.sflag [#allocation10], %s273_s1 }
  0x3d   : > { %1017 = dma.done.wait (%p1163_p7), %s274_s4, 128  }
  0x3e   : > { %1019 = vsyncadd (%p1163_p7), %s274_s4, 4294967168  ;;  %s285_s23 = sand.u32 1, %s1034_s16  }
  0x3f   : > { %s1260_s28 = sshll.u32 %s285_s23, 3 }
  0x40   : > { %s287_s11 = scalar_lea.vmem [#allocation11], %s1260_s28 }
  0x41   : > { %1021 = dma.done.wait (%p1171_p9), %s274_s4, 128  }
  0x42   : > { %1023 = vsyncadd (%p1171_p9), %s274_s4, 4294967168  ;;  %s294_s12 = scalar_lea.sflag [#allocation13], %s285_s23  ;;  %s297_s18 = scalar_lea.vmem [#allocation12], %s1260_s28 }
  0x43   : > { %1025 = dma.done.wait (%p1171_p9), %s294_s12, 128  }
  0x44   : > { %1027 = vsyncadd (%p1171_p9), %s294_s12, 4294967168  ;;  %p337_p6 = scmp.lt.s32.totalorder %s1058_s22, 1  ;;  %s1362_s6 = sld [smem:[#allocation24_spill]] }
  0x45   : > { %s1363_s26 = sld [smem:[#allocation18_spill]] }
  0x46   : > { %s338_s29 = scalar_select %p337_p6, %s1058_s22, 1 }
  0x48   : > { %s703_s8 = sshll.u32 %s338_s29, 3 }
  0x4a   : > { %s1277_s15 = scalar_lea.vmem %s1362_s6, %s703_s8 }
  0x4b   : > { %p704_p7 = scmp.ne.s32.totalorder %s1363_s26, 0 }
  0x4d   : > { %344 = sbr.rel (%p704_p7) target bundleno = 354 (0x162), region = 56 }
  0x52   : > { %v345_v0 = vld [vmem:[%s267_s30] sm:$0xff]  ;;  %vm347_vm0 = vcmask 261120   ;;  %v363_v2 = vld [vmem:[%s277_s21] sm:$0xff]  ;;  %vm391_vm7 = vcmask 130048   ;;  %v1072_v30 = vmov 0.0   ;;  %vm385_vm8 = vcmask 7168  }
  0x53   : > { %v346_v1 = vmul.f32 %v345_v0, %v345_v0  ;;  %v364_v4 = vmul.f32 %v363_v2, %v363_v2  ;;  %392 = vst.msk [vmem:[#allocation5] sm:$0xff] %vm391_vm7, %v1072_v30 }
  0x54   : > { %393 = vst.msk [vmem:[#allocation6] sm:$0xff] %vm391_vm7, %v1072_v30 }
  0x55   : > { %v348_v3 = vsel %vm347_vm0, %v346_v1, 0.0  ;;  %v365_v5 = vsel %vm347_vm0, %v364_v4, 0.0 }
  0x56   : > { %349 = vadd.xlane.f32.xlu0 %v348_v3 }
  0x5e   : > { %366 = vadd.xlane.f32.xlu0 %v365_v5 }
  0xc9   : > { %v350_v6 = vpop.xlane.xlu0 %349 }
  0xca   : > { %v351_v7 = vmax.f32 %v350_v6, 1e-16 }
  0xcc   : > { %832 = vrsqrt.f32 %v351_v7  ;;  %vm358_vm2 = vweird.f32 %v351_v7 }
  0xd1   : > { %v367_v8 = vpop.xlane.xlu0 %366 }
  0xd2   : > { %v833_v9 = vpop.eup %832  ;;  %v368_v10 = vmax.f32 %v367_v8, 1e-16 }
  0xd3   : > { %v353_v11 = vmul.f32 %v833_v9, %v351_v7  ;;  %vm359_vm1 = vweird.f32 %v833_v9 }
  0xd4   : > { %834 = vrsqrt.f32 %v368_v10  ;;  %vm360_vm3 = vmor %vm358_vm2, %vm359_vm1  ;;  %vm375_vm5 = vweird.f32 %v368_v10 }
  0xd5   : > { %v354_v12 = vmul.f32 %v833_v9, %v353_v11 }
  0xd7   : > { %v355_v13 = vmul.f32 0.5, %v354_v12 }
  0xd9   : > { %v356_v14 = vsub.f32 1.5, %v355_v13 }
  0xda   : > { %v835_v15 = vpop.eup %834 }
  0xdb   : > { %v370_v16 = vmul.f32 %v835_v15, %v368_v10  ;;  %v357_v17 = vmul.f32 %v833_v9, %v356_v14  ;;  %vm376_vm4 = vweird.f32 %v835_v15 }
  0xdc   : > { %vm377_vm6 = vmor %vm375_vm5, %vm376_vm4 }
  0xdd   : > { %v371_v18 = vmul.f32 %v835_v15, %v370_v16  ;;  %v361_v19 = vsel %vm360_vm3, %v833_v9, %v357_v17 }
  0xde   : > { %v362_v20 = vmul.f32 %v361_v19, %v345_v0 }
  0xdf   : > { %v372_v21 = vmul.f32 0.5, %v371_v18 }
  0xe0   : > { %v387_v22 = vmul.f32 2.0, %v362_v20 }
  0xe1   : > { %v373_v23 = vsub.f32 1.5, %v372_v21 }
  0xe2   : > { %388 = vst.msk [vmem:[#allocation2] sm:$0xff] %vm347_vm0, %v387_v22 }
  0xe3   : > { %v374_v24 = vmul.f32 %v835_v15, %v373_v23 }
  0xe5   : > { %v378_v25 = vsel %vm377_vm6, %v835_v15, %v374_v24 }
  0xe6   : > { %v379_v26 = vmul.f32 %v378_v25, %v363_v2 }
  0xe8   : > { %v380_v27 = vmul.f32 %v379_v26, %v362_v20  ;;  %v389_v28 = vmul.f32 2.0, %v379_v26 }
  0xea   : > { %v381_v29 = vsel %vm347_vm0, %v380_v27, 0.0  ;;  %390 = vst.msk [vmem:[#allocation3] sm:$0xff] %vm347_vm0, %v389_v28 }
  0xeb   : > { %382 = vadd.xlane.f32.xlu1 %v381_v29 }
 0x15e   : > { %v383_v31 = vpop.xlane.xlu1 %382 }
 0x15f   : > { %v384_v32 = vmul.f32 2.0, %v383_v31 }
 0x161   : > { %386 = vst.msk [vmem:[#allocation4] sm:$0xff] %vm385_vm8, %v384_v32 }
 0x162 PF: > { %vm396_vm9 = vcmask 261120   ;;  %v412_v33 = vld [vmem:[%s297_s18] sm:$0xff]  ;;  %v394_v35 = vld [vmem:[%s287_s11] sm:$0xff]  ;;  %s1364_s5 = sld [smem:[#allocation18_spill]]  ;;  %v484_v61 = vlaneseq  ;;  %s711_s27 = sshll.u32 %s1058_s22, 3  ;;  %vm1073_vm2 = vmmov 1  }
 0x163   : > { %v413_v34 = vmul.f32 %v412_v33, %v412_v33  ;;  %v395_v37 = vmul.f32 %v394_v35, %v394_v35  ;;  %v429_v59 = vld [vmem:[#allocation2] sm:$0xff]  ;;  %v459_v60 = vld [vmem:[#allocation3] sm:$0xff]  ;;  %v486_v1 = vstv %s711_s27  ;;  %v505_v14 = vld [vmem:[#allocation5] sm:$0xff]  ;;  %vm507_vm6 = vcmask 130048  }
 0x164   : > { %v489_v62 = vand.u32 127, %v484_v61  ;;  %v485_v0 = vshrl.u32 %v484_v61, 7  ;;  %v512_v15 = vld [vmem:[#allocation6] sm:$0xff] }
 0x165   : > { %v414_v36 = vsel %vm396_vm9, %v413_v34, 0.0  ;;  %v397_v38 = vsel %vm396_vm9, %v395_v37, 0.0 }
 0x166   : > { %415 = vadd.xlane.f32.xlu0 %v414_v36  ;;  %v713_v63 = vadd.s32 4294967288, %v489_v62  ;;  %vm490_vm0 = vcmp.lt.s32.totalorder %v489_v62, 8  ;;  %v487_v4 = vadd.s32 %v486_v1, %v485_v0 }
 0x167   : > { %vm499_vm3 = vmxor %vm490_vm0, %vm1073_vm2 }
 0x168   : > { %s712_s7 = sshll.u32 %s1364_s5, 3  ;;  %v493_v2 = vsel %vm490_vm0, %v489_v62, %v713_v63  ;;  %p716_p8 = scmp.ne.s32.totalorder %s1364_s5, 1 }
 0x169   : > { %v494_v3 = vstv %s712_s7  ;;  %s1074_s22 = smov (!%p716_p8), 1  }
 0x16a   : > { %v495_v5 = vadd.s32 %v494_v3, %v493_v2 }
 0x16c   : > { %vm496_vm1 = vcmp.eq.s32.totalorder %v487_v4, %v495_v5 }
 0x16d   : > { %vm497_vm4 = vmand %vm490_vm0, %vm496_vm1 }
 0x16e   : > { %398 = vadd.xlane.f32.xlu0 %v397_v38  ;;  %vm500_vm5 = vmand %vm499_vm3, %vm496_vm1 }
 0x1d9   : > { %v416_v39 = vpop.xlane.xlu0 %415 }
 0x1da   : > { %v417_v40 = vmax.f32 %v416_v39, 1e-16 }
 0x1dc   : > { %836 = vrsqrt.f32 %v417_v40  ;;  %vm424_vm11 = vweird.f32 %v417_v40 }
 0x1e1   : > { %v399_v41 = vpop.xlane.xlu0 %398 }
 0x1e2   : > { %v837_v42 = vpop.eup %836  ;;  %v400_v43 = vmax.f32 %v399_v41, 1e-16 }
 0x1e3   : > { %v419_v44 = vmul.f32 %v837_v42, %v417_v40  ;;  %vm425_vm10 = vweird.f32 %v837_v42 }
 0x1e4   : > { %838 = vrsqrt.f32 %v400_v43  ;;  %vm426_vm12 = vmor %vm424_vm11, %vm425_vm10  ;;  %vm407_vm14 = vweird.f32 %v400_v43 }
 0x1e5   : > { %v420_v45 = vmul.f32 %v837_v42, %v419_v44 }
 0x1e7   : > { %v421_v46 = vmul.f32 0.5, %v420_v45 }
 0x1e9   : > { %v422_v47 = vsub.f32 1.5, %v421_v46 }
 0x1ea   : > { %v839_v48 = vpop.eup %838 }
 0x1eb   : > { %v402_v49 = vmul.f32 %v839_v48, %v400_v43  ;;  %v423_v50 = vmul.f32 %v837_v42, %v422_v47  ;;  %vm408_vm13 = vweird.f32 %v839_v48 }
 0x1ec   : > { %vm409_vm15 = vmor %vm407_vm14, %vm408_vm13 }
 0x1ed   : > { %v403_v51 = vmul.f32 %v839_v48, %v402_v49  ;;  %v427_v52 = vsel %vm426_vm12, %v837_v42, %v423_v50 }
 0x1ee   : > { %v428_v53 = vmul.f32 %v427_v52, %v412_v33 }
 0x1ef   : > { %v404_v54 = vmul.f32 0.5, %v403_v51 }
 0x1f0   : > { %705 = vmatpush.xpose.msk.msra.mxu0 %vm396_vm9, %v428_v53  ;;  %708 = vmatpush.xpose.msk.msra.mxu1 %vm396_vm9, %v428_v53 }
 0x1f1   : > { %v405_v55 = vsub.f32 1.5, %v404_v54 }
 0x1f3   : > { %v406_v56 = vmul.f32 %v839_v48, %v405_v55 }
 0x1f5   : > { %v410_v57 = vsel %vm409_vm15, %v839_v48, %v406_v56 }
 0x1f6   : > { %v411_v58 = vmul.f32 %v410_v57, %v394_v35 }
 0x1f8   : > { %706 = vmatpush.xpose.msk.msra.mxu0 %vm396_vm9, %v411_v58  ;;  %709 = vmatpush.xpose.msk.msra.mxu1 %vm396_vm9, %v411_v58 }
 0x1fb   : > { %707 = vmatmul.msk.f32.vlgmr.msra.gmra.mxu0 %vm396_vm9, %v429_v59  ;;  %710 = vmatmul.msk.f32.vlgmr.msra.gmra.mxu1 %vm396_vm9, %v459_v60 }
 0x278   : > { %v456_v6 = vpop.f32.mrf.mxu0  ;;  %v480_v7 = vpop.f32.mrf.mxu1 }
 0x279   : > { %v498_v8 = vsel %vm497_vm4, -1e+30, %v456_v6  ;;  %v501_v9 = vsel %vm500_vm5, -1e+30, %v480_v7 }
 0x27a   : > { %v714_v10 = vadd.f32 -2.0, %v498_v8  ;;  %v715_v11 = vadd.f32 -2.0, %v501_v9 }
 0x27c   : > { %v503_v12 = vmul.f32 1.442695, %v714_v10  ;;  %v510_v13 = vmul.f32 1.442695, %v715_v11 }
 0x27e   : > { %840 = vpow2.f32 %v503_v12 }
 0x27f   : > { %842 = vpow2.f32 %v510_v13 }
 0x284   : > { %v841_v16 = vpop.eup %840  ;;  %518 = sbr.rel (%p716_p8) target bundleno = 903 (0x387), region = 60 }
 0x285   : > { %v843_v17 = vpop.eup %842  ;;  %v506_v18 = vadd.f32 %v841_v16, %v505_v14 }
 0x286   : > { %v513_v19 = vadd.f32 %v843_v17, %v512_v15 }
 0x287   : > { %508 = vst.msk [vmem:[#allocation5] sm:$0xff] %vm507_vm6, %v506_v18 }
 0x288   : > { %514 = vst.msk [vmem:[#allocation6] sm:$0xff] %vm507_vm6, %v513_v19 }
 0x289   : > { %v519_v27 = vld [vmem:[#allocation4] sm:$0xff]  ;;  %vm540_vm7 = vcmask 7168   ;;  %vm542_vm8 = vcmask 15360  }
 0x28e   : > { %v520_v22 = vld [vmem:[#allocation5] sm:$0xff] }
 0x28f   : > { %v527_v20 = vld [vmem:[#allocation6] sm:$0xff]  ;;  %v521_v23 = vsel %vm507_vm6, %v520_v22, 0.0 }
 0x290   : > { %v528_v21 = vsel %vm507_vm6, %v527_v20, 0.0 }
 0x291   : > { %529 = vadd.xlane.f32.xlu0 %v528_v21 }
 0x299   : > { %522 = vadd.xlane.f32.xlu0 %v521_v23 }
 0x304   : > { %v530_v24 = vpop.xlane.xlu0 %529 }
 0x305   : > { %844 = vlog2.f32 %v530_v24 }
 0x30b   : > { %v845_v25 = vpop.eup %844 }
 0x30c   : > { %v532_v26 = vmul.f32 0.6931472, %v845_v25  ;;  %v523_v30 = vpop.xlane.xlu0 %522 }
 0x30d   : > { %846 = vlog2.f32 %v523_v30 }
 0x30e   : > { %v533_v28 = vadd.f32 2.0, %v532_v26 }
 0x310   : > { %v535_v29 = vsub.f32 %v533_v28, %v519_v27 }
 0x312   : > { %537 = vrot.lane.b32.xlu1 %v535_v29, %s1074_s22 }
 0x313   : > { %v847_v31 = vpop.eup %846 }
 0x314   : > { %v525_v32 = vmul.f32 0.6931472, %v847_v31 }
 0x316   : > { %v526_v33 = vadd.f32 2.0, %v525_v32 }
 0x318   : > { %v534_v34 = vsub.f32 %v526_v33, %v519_v27 }
 0x384   : > { %v538_v35 = vpop.permute.xlu1 %537 }
 0x385   : > { %v541_v36 = vsel %vm540_vm7, %v534_v34, %v538_v35 }
 0x386   : > { %543 = vst.msk [vmem:[%s1277_s15] sm:$0xff] %vm542_vm8, %v541_v36 }
 0x387 PF: > { %s23_s25 = sadd.s32 1, %s1070_s25   ;;  %s1365_s21 = sld [smem:[#allocation19_spill]] }
 0x388   : > { %p20_p9 = scmp.ge.s32.totalorder %s23_s25, 6   ;;  %s1366_s23 = sld [smem:[#allocation20_spill]] }
 0x389   : > { %s1367_s15 = smov %s1034_s16  ;;  %s1368_s16 = smov %s1038_s17 }
 0x38a   : > { %s1369_s17 = smov %s1229_s14  ;;  %s1370_s18 = smov %s1046_s19 }
 0x38b   : > { %s1371_s19 = smov %s1050_s20  ;;  %s1372_s20 = smov %s1239_s0 }
 0x38c   : > { %s1373_s22 = smov %s1066_s24  ;;  %s1374_s24 = smov %s1380_s10 }
 0x38d   :  { %22 = sbr.rel (!%p20_p9) target bundleno = 16 (0x10), region = 121 }
 0x392   :  { %563 = vsyncpa [#allocation8], 1 }
 0x393   :  { %565 = vsyncpa [#allocation8 + $0x1], 1 }
 0x394   :  { %566 = vsyncpa [#allocation10], 1 }
 0x395   :  { %568 = vsyncpa [#allocation10 + $0x1], 1 }
 0x396   :  { %569 = vsyncpa [#allocation13], 1 }
 0x397   :  { %571 = vsyncpa [#allocation13 + $0x1], 1 }

</bundles_post_ra>
